<compile_context>
chip_gen: v7x
topology: tpu7x:2x2x1
jax: 0.10.0
libtpu: 0.0.40
codegen_flags: <defaults>
</compile_context>

<pallas_src>
import math

import numpy as np
import jax
import jax.numpy as jnp
from jax import lax
from jax.experimental import pallas as pl
from jax.experimental.pallas import tpu as pltpu


SPECIAL_TRIPLE_ID = 50267          # one marker token per triple
SPECIAL_HYPO_IDS = (50265, 50266)  # forward / backward hypothesis markers


# ----------------------------------------------------------------------------
# Pallas kernel: whole-batch bilinear matrix attention  s_l = X W_l Y^T + b
# (both label planes fused into one first-stage GEMM) + 2-way label softmax
# + score-matrix mask.  Single invocation, no grid.
# ----------------------------------------------------------------------------
def _bilinear_kernel(h_ref, t_ref, w_ref, b_ref, mask_ref, score_ref, prob_ref):
    # h_ref   : (B*M, D)      bf16   hypo embeddings, batch folded into sublanes
    # t_ref   : (B, Npad, D)  bf16   triple embeddings, zero-padded to 128-lane Npad
    # w_ref   : (D, 2*D)      bf16   packed weight: w_ref[:, l*D:(l+1)*D] = W_l
    # b_ref   : (1,)          f32    scalar bias (SMEM)
    # mask_ref: (B, M, Npad)  f32    score-matrix mask (zero in padded lanes)
    # score_ref / prob_ref : (2, B, M, Npad) f32
    B, n_pad, D = t_ref.shape
    M = h_ref.shape[0] // B
    bias = b_ref[0]

    # Stage 1: single MXU GEMM for both label planes and the whole batch.
    hw = jnp.dot(h_ref[...], w_ref[...],
                 preferred_element_type=jnp.float32)            # (B*M, 2D) f32
    hw0 = hw[:, :D].reshape(B, M, D).astype(h_ref.dtype)        # h @ W_0, bf16
    hw1 = hw[:, D:].reshape(B, M, D).astype(h_ref.dtype)        # h @ W_1, bf16

    # Stage 2: batched GEMM contracting trailing feature dims (no transpose of t).
    t = t_ref[...]
    dn = (((2,), (2,)), ((0,), (0,)))
    s0 = lax.dot_general(hw0, t, dn,
                         preferred_element_type=jnp.float32) + bias   # (B, M, Npad)
    s1 = lax.dot_general(hw1, t, dn,
                         preferred_element_type=jnp.float32) + bias   # (B, M, Npad)

    score_ref[0] = s0
    score_ref[1] = s1

    # 2-way softmax over the label axis + mask; everything is 128-lane dense.
    mx = jnp.maximum(s0, s1)
    e0 = jnp.exp(s0 - mx)
    e1 = jnp.exp(s1 - mx)
    inv = pl.reciprocal(e0 + e1, approx=True)
    msk = mask_ref[...]
    prob_ref[0] = e0 * inv * msk
    prob_ref[1] = e1 * inv * msk


def bilinear_attention_tpu(hypo, triple, weight, bias, mask2d):
    """hypo/triple: (B, M, D) f32; weight: (2, D, D) f32; bias: (1,) f32;
    mask2d: (B, M, M) f32 {0,1}.  Returns (scores, probs), each (B, 2, M, M) f32."""
    B, M, D = hypo.shape
    L = weight.shape[0]
    assert L == 2
    # Pad the triple axis to a multiple of 128 so the kernel outputs (and all
    # elementwise work) are lane-dense -- no masked vst.msk partial stores.
    n_pad = ((M + 127) // 128) * 128

    h2 = hypo.reshape(B * M, D).astype(jnp.bfloat16)
    t_pad = jnp.pad(triple.astype(jnp.bfloat16), ((0, 0), (0, n_pad - M), (0, 0)))
    # w_cat[d, l*D + e] = weight[l, d, e]  =>  (h @ w_cat)[:, l*D:(l+1)*D] = h @ W_l
    w_cat = jnp.transpose(weight, (1, 0, 2)).reshape(D, L * D).astype(jnp.bfloat16)
    m_pad = jnp.pad(mask2d.astype(jnp.float32), ((0, 0), (0, 0), (0, n_pad - M)))

    scores_p, probs_p = pl.pallas_call(
        _bilinear_kernel,
        out_shape=(jax.ShapeDtypeStruct((L, B, M, n_pad), jnp.float32),
                   jax.ShapeDtypeStruct((L, B, M, n_pad), jnp.float32)),
        in_specs=[
            pl.BlockSpec(memory_space=pltpu.MemorySpace.VMEM),   # hypo   (B*M, D)
            pl.BlockSpec(memory_space=pltpu.MemorySpace.VMEM),   # triple (B, Npad, D)
            pl.BlockSpec(memory_space=pltpu.MemorySpace.VMEM),   # packed weight (D, 2D)
            pl.BlockSpec(memory_space=pltpu.MemorySpace.SMEM),   # bias (1,)
            pl.BlockSpec(memory_space=pltpu.MemorySpace.VMEM),   # mask (B, M, Npad)
        ],
        out_specs=(pl.BlockSpec(memory_space=pltpu.MemorySpace.VMEM),
                   pl.BlockSpec(memory_space=pltpu.MemorySpace.VMEM)),
        # No grid -> the bf16 packed weight is DMA'd exactly once (no double
        # buffering); at the real D=1024 it is 4 MiB and fits the 64 MiB v7x VMEM.
    )(h2, t_pad, w_cat, bias.astype(jnp.float32), m_pad)

    # (L, B, M, Npad) -> (B, L, M, M); keep the label axis non-minor for epilogue.
    scores = jnp.transpose(scores_p[..., :M], (1, 0, 2, 3))
    probs = jnp.transpose(probs_p[..., :M], (1, 0, 2, 3))
    return scores, probs


# ----------------------------------------------------------------------------
# On-device special-token gather + full forward (single jit, no host round trip).
# ----------------------------------------------------------------------------
def _gather_special_reps(input_ids, hidden, max_num_classes):
    """jnp equivalent of the torch special-token gather loop
    (single_special_tok_representation=True path)."""
    B, S, D = hidden.shape
    M = max_num_classes
    pos = jnp.arange(S, dtype=jnp.int32)

    trip_mask = input_ids == SPECIAL_TRIPLE_ID                           # (B, S)
    key = jnp.where(trip_mask, pos[None, :], jnp.int32(S))
    order = jnp.argsort(key, axis=-1)[:, :M]                             # first M triple pos, in order
    valid = jnp.take_along_axis(trip_mask, order, axis=1)                # (B, M)
    triple_embs = jnp.take_along_axis(hidden, order[:, :, None], axis=1)
    triple_embs = triple_embs * valid[:, :, None].astype(hidden.dtype)   # zero-pad missing rows
    num_triples = jnp.sum(trip_mask, axis=-1).astype(jnp.int32)          # (B,)

    b_idx = jnp.arange(B)
    hypo_f = hidden[b_idx, jnp.argmax(input_ids == SPECIAL_HYPO_IDS[0], axis=-1)]
    hypo_b = hidden[b_idx, jnp.argmax(input_ids == SPECIAL_HYPO_IDS[1], axis=-1)]
    hypo_embs = jnp.zeros((B, M, D), hidden.dtype)
    hypo_embs = hypo_embs.at[:, 0, :].set(hypo_f).at[:, 1, :].set(hypo_b)
    return hypo_embs, triple_embs, num_triples


@jax.jit
def _forward_device(weight, bias, input_ids, last_hidden_state,
                    score_matrix_mask, hypo_label_matrix):
    M = score_matrix_mask.shape[1]

    hypo_embs, triple_embs, num_triples = _gather_special_reps(
        input_ids, last_hidden_state, M)
    mask2d = score_matrix_mask[..., 0].astype(jnp.float32)               # (B, M, M)

    # Pallas hot path: bilinear attention + 2-way softmax + mask.
    scores4, probs4 = bilinear_attention_tpu(
        hypo_embs, triple_embs, weight, bias, mask2d)                    # (B, 2, M, M)

    # Soft-label CE over masked pairs (mean reduction), reduced over the label
    # axis=1 directly in the (B, 2, M, M) layout -- no transpose of the scores.
    lsm = jax.nn.log_softmax(scores4, axis=1)
    labels_l = jnp.moveaxis(hypo_label_matrix.astype(jnp.float32), -1, 1)
    per_pair = -jnp.sum(labels_l * lsm, axis=1)                          # (B, M, M)
    n_pairs = jnp.maximum(jnp.sum(mask2d), 1.0)
    loss = jnp.sum(per_pair * mask2d) / n_pairs

    # Predictions: argmax over the label axis (tie -> class 0, like torch/jnp argmax).
    pred = (probs4[:, 1] > probs4[:, 0]).astype(jnp.int32)               # (B, M, M)
    col_valid = jnp.arange(M, dtype=jnp.int32)[None, :] < num_triples[:, None]
    f_zero = jnp.sum((pred[:, 0, :] == 0) & col_valid, axis=-1)
    b_zero = jnp.sum((pred[:, 1, :] == 0) & col_valid, axis=-1)
    predictions = ((f_zero == 0) & (b_zero == 0)).astype(jnp.int32)      # (B,)

    # Returned tensors in the module's (B, M, M, 2) layout.
    matrix = jnp.transpose(scores4, (0, 2, 3, 1))
    pred_probs_matrix = jnp.transpose(probs4, (0, 2, 3, 1))
    predicted_2d_scores = matrix * score_matrix_mask.astype(matrix.dtype)

    return {
        'loss': loss,
        'predictions': predictions,
        'predicted_2d_scores': predicted_2d_scores,
        'element_matrix': matrix,
        'pred_probs_matrix': pred_probs_matrix,
    }


class TweakClassifierPallas:
    """JAX/Pallas version of TweakClassifier's element-classification path
    (train_with_sequence_loss=False, single_special_tok_representation=True)."""

    def __init__(self, hidden_size, seed=0):
        self.hidden_size = hidden_size
        # BilinearMatrixAttention(label_dim=2): weight (2, D, D), xavier_uniform-ish init.
        fan_in = hidden_size * hidden_size
        fan_out = 2 * hidden_size
        bound = math.sqrt(6.0 / (fan_in + fan_out))
        key = jax.random.PRNGKey(seed)
        self.weight = jax.random.uniform(
            key, (2, hidden_size, hidden_size), dtype=jnp.float32,
            minval=-bound, maxval=bound)
        self.bias = jnp.zeros((1,), dtype=jnp.float32)

    def forward(self, input_ids, last_hidden_state, score_matrix_mask, hypo_label_matrix):
        input_ids = jnp.asarray(np.asarray(input_ids), dtype=jnp.int32)
        return _forward_device(self.weight, self.bias, input_ids,
                               jnp.asarray(last_hidden_state, jnp.float32),
                               jnp.asarray(score_matrix_mask, jnp.float32),
                               jnp.asarray(hypo_label_matrix, jnp.float32))


if __name__ == "__main__":
    # Small shapes consistent with the module's forward (hidden scaled down from 1024).
    B, S, D, M = 2, 32, 128, 8

    key = jax.random.PRNGKey(0)
    k_hid, k_ids, k_lab = jax.random.split(key, 3)

    # Synthetic base-model output.
    last_hidden_state = 0.05 * jax.random.normal(k_hid, (B, S, D), dtype=jnp.float32)

    # Build input_ids with special tokens at known positions.
    input_ids = np.asarray(
        jax.random.randint(k_ids, (B, S), minval=5, maxval=1000)).astype(np.int64)
    triple_positions = [[2, 7, 12], [1, 5, 9, 13]]
    hypo_positions = [(20, 25), (18, 22)]
    for b in range(B):
        for p in triple_positions[b]:
            input_ids[b, p] = SPECIAL_TRIPLE_ID
        input_ids[b, hypo_positions[b][0]] = SPECIAL_HYPO_IDS[0]
        input_ids[b, hypo_positions[b][1]] = SPECIAL_HYPO_IDS[1]

    # score_matrix_mask: rows 0,1 (the two hypo reps) x columns < num_triples.
    mask = np.zeros((B, M, M, 1), dtype=np.float32)
    for b in range(B):
        mask[b, 0:2, 0:len(triple_positions[b]), 0] = 1.0
    score_matrix_mask = jnp.asarray(mask)

    # hypo_label_matrix: one-hot soft labels over the 2 classes.
    lab_idx = jax.random.randint(k_lab, (B, M, M), minval=0, maxval=2)
    hypo_label_matrix = jax.nn.one_hot(lab_idx, 2, dtype=jnp.float32)

    model = TweakClassifierPallas(hidden_size=D, seed=0)
    results = model.forward(input_ids, last_hidden_state,
                            score_matrix_mask, hypo_label_matrix)
    jax.block_until_ready(results['loss'])
    jax.block_until_ready(results['element_matrix'])

    # ---- reference check: torch-style host gather + bf16-faithful bilinear math ----
    ids_np = np.asarray(input_ids)
    hidden_np = np.asarray(last_hidden_state)
    hypo_list, triple_list = [], []
    for b in range(B):
        idx = []
        for s_id in [SPECIAL_TRIPLE_ID, *SPECIAL_HYPO_IDS]:
            idx += list(np.nonzero(ids_np[b] == s_id)[0])
        tgt = hidden_np[b][np.array(idx, dtype=np.int64)]
        tr, hy = tgt[:-2], tgt[-2:]
        triple_list.append(np.pad(tr, ((0, M - tr.shape[0]), (0, 0))))
        hypo_list.append(np.pad(hy, ((0, M - hy.shape[0]), (0, 0))))
    hypo_ref = np.stack(hypo_list, 0).astype(np.float32)
    triple_ref = np.stack(triple_list, 0).astype(np.float32)

    def bf16_round(x):
        return np.asarray(jnp.asarray(x, jnp.float32).astype(jnp.bfloat16).astype(jnp.float32))

    hy_b, tr_b = bf16_round(hypo_ref), bf16_round(triple_ref)
    w_b = bf16_round(np.asarray(model.weight))
    hw_ref = bf16_round(np.einsum('bmd,lde->blme', hy_b, w_b).astype(np.float32))
    ref_scores = np.einsum('blme,bne->blmn', hw_ref, tr_b).astype(np.float32) \
        + float(model.bias[0])
    ref_matrix = np.transpose(ref_scores, (0, 2, 3, 1))
    np.testing.assert_allclose(np.asarray(results['element_matrix']), ref_matrix,
                               rtol=1e-3, atol=1e-4)

    # masked softmax probs (kernel uses an approximate reciprocal -> loose tolerance).
    e = np.exp(ref_matrix - ref_matrix.max(-1, keepdims=True))
    ref_probs = e / e.sum(-1, keepdims=True) * np.asarray(score_matrix_mask)
    np.testing.assert_allclose(np.asarray(results['pred_probs_matrix']), ref_probs,
                               rtol=0, atol=5e-3)

    assert np.isfinite(float(results['loss']))
    assert results['predictions'].shape == (B,)

    print("KERNEL_OK")
</pallas_src>

<mosaic_0001>
module attributes {stable_mosaic.version = 11 : i64} {
  func.func @_bilinear_kernel(%arg0: memref<16x128xbf16, #tpu.memory_space<vmem>>, %arg1: memref<2x128x128xbf16, #tpu.memory_space<vmem>>, %arg2: memref<128x256xbf16, #tpu.memory_space<vmem>>, %arg3: memref<1xf32, #tpu.memory_space<smem>>, %arg4: memref<2x8x128xf32, #tpu.memory_space<vmem>>, %arg5: memref<2x2x8x128xf32, #tpu.memory_space<vmem>>, %arg6: memref<2x2x8x128xf32, #tpu.memory_space<vmem>>) attributes {dimension_semantics = [], scalar_prefetch = 0 : i64, scratch_operands = 0 : i64, tpu.core_type = #tpu.core_type<tc>} {
    %c0 = arith.constant 0 : index
    %0 = memref.load %arg3[%c0] : memref<1xf32, #tpu.memory_space<smem>>
    %c0_0 = arith.constant 0 : index
    %c0_1 = arith.constant 0 : index
    %1 = vector.load %arg0[%c0_0, %c0_1] : memref<16x128xbf16, #tpu.memory_space<vmem>>, vector<16x128xbf16>
    %c0_2 = arith.constant 0 : index
    %c0_3 = arith.constant 0 : index
    %2 = vector.load %arg2[%c0_2, %c0_3] : memref<128x256xbf16, #tpu.memory_space<vmem>>, vector<128x256xbf16>
    %cst = arith.constant dense<0.000000e+00> : vector<16x256xf32>
    %3 = tpu.matmul %1, %2, %cst {dimension_numbers = #tpu.dot_dimension_numbers<[1], [0], [0], [1], [0, 0, 1, 1], [], []>} : vector<16x128xbf16>, vector<128x256xbf16>, vector<16x256xf32> -> vector<16x256xf32>
    %4 = vector.extract_strided_slice %3 {offsets = [0, 0], sizes = [16, 128], strides = [1, 1]} : vector<16x256xf32> to vector<16x128xf32>
    %5 = vector.shape_cast %4 : vector<16x128xf32> to vector<2x8x128xf32>
    %6 = arith.truncf %5 : vector<2x8x128xf32> to vector<2x8x128xbf16>
    %7 = vector.extract_strided_slice %3 {offsets = [0, 128], sizes = [16, 128], strides = [1, 1]} : vector<16x256xf32> to vector<16x128xf32>
    %8 = vector.shape_cast %7 : vector<16x128xf32> to vector<2x8x128xf32>
    %9 = arith.truncf %8 : vector<2x8x128xf32> to vector<2x8x128xbf16>
    %c0_4 = arith.constant 0 : index
    %c0_5 = arith.constant 0 : index
    %c0_6 = arith.constant 0 : index
    %10 = vector.load %arg1[%c0_4, %c0_5, %c0_6] : memref<2x128x128xbf16, #tpu.memory_space<vmem>>, vector<2x128x128xbf16>
    %cst_7 = arith.constant dense<0.000000e+00> : vector<2x8x128xf32>
    %11 = tpu.matmul %6, %10, %cst_7 {dimension_numbers = #tpu.dot_dimension_numbers<[2], [2], [1], [1], [0, 0, 0, 1, 1, 1], [0], [0]>} : vector<2x8x128xbf16>, vector<2x128x128xbf16>, vector<2x8x128xf32> -> vector<2x8x128xf32>
    %12 = vector.broadcast %0 : f32 to vector<2x8x128xf32>
    %13 = arith.addf %11, %12 : vector<2x8x128xf32>
    %cst_8 = arith.constant dense<0.000000e+00> : vector<2x8x128xf32>
    %14 = tpu.matmul %9, %10, %cst_8 {dimension_numbers = #tpu.dot_dimension_numbers<[2], [2], [1], [1], [0, 0, 0, 1, 1, 1], [0], [0]>} : vector<2x8x128xbf16>, vector<2x128x128xbf16>, vector<2x8x128xf32> -> vector<2x8x128xf32>
    %15 = vector.broadcast %0 : f32 to vector<2x8x128xf32>
    %16 = arith.addf %14, %15 : vector<2x8x128xf32>
    %c0_9 = arith.constant 0 : index
    %c0_10 = arith.constant 0 : index
    %c0_11 = arith.constant 0 : index
    %c0_12 = arith.constant 0 : index
    %17 = vector.load %arg5[%c0_9, %c0_10, %c0_11, %c0_12] : memref<2x2x8x128xf32, #tpu.memory_space<vmem>>, vector<1x2x8x128xf32>
    %18 = vector.shape_cast %17 : vector<1x2x8x128xf32> to vector<2x8x128xf32>
    %19 = vector.shape_cast %13 : vector<2x8x128xf32> to vector<1x2x8x128xf32>
    tpu.vector_store %arg5[%c0_9, %c0_10, %c0_11, %c0_12], %19 {strides = array<i32>} : memref<2x2x8x128xf32, #tpu.memory_space<vmem>>, vector<1x2x8x128xf32>,
    %c1 = arith.constant 1 : index
    %c0_13 = arith.constant 0 : index
    %c0_14 = arith.constant 0 : index
    %c0_15 = arith.constant 0 : index
    %20 = vector.load %arg5[%c1, %c0_13, %c0_14, %c0_15] : memref<2x2x8x128xf32, #tpu.memory_space<vmem>>, vector<1x2x8x128xf32>
    %21 = vector.shape_cast %20 : vector<1x2x8x128xf32> to vector<2x8x128xf32>
    %22 = vector.shape_cast %16 : vector<2x8x128xf32> to vector<1x2x8x128xf32>
    tpu.vector_store %arg5[%c1, %c0_13, %c0_14, %c0_15], %22 {strides = array<i32>} : memref<2x2x8x128xf32, #tpu.memory_space<vmem>>, vector<1x2x8x128xf32>,
    %23 = arith.maximumf %13, %16 : vector<2x8x128xf32>
    %24 = arith.subf %13, %23 : vector<2x8x128xf32>
    %25 = math.exp %24 : vector<2x8x128xf32>
    %26 = arith.subf %16, %23 : vector<2x8x128xf32>
    %27 = math.exp %26 : vector<2x8x128xf32>
    %28 = arith.addf %25, %27 : vector<2x8x128xf32>
    %29 = tpu.reciprocal %28 {approx = true} : vector<2x8x128xf32> -> vector<2x8x128xf32>
    %c0_16 = arith.constant 0 : index
    %c0_17 = arith.constant 0 : index
    %c0_18 = arith.constant 0 : index
    %30 = vector.load %arg4[%c0_16, %c0_17, %c0_18] : memref<2x8x128xf32, #tpu.memory_space<vmem>>, vector<2x8x128xf32>
    %31 = arith.mulf %25, %29 : vector<2x8x128xf32>
    %32 = arith.mulf %31, %30 : vector<2x8x128xf32>
    %c0_19 = arith.constant 0 : index
    %c0_20 = arith.constant 0 : index
    %c0_21 = arith.constant 0 : index
    %c0_22 = arith.constant 0 : index
    %33 = vector.load %arg6[%c0_19, %c0_20, %c0_21, %c0_22] : memref<2x2x8x128xf32, #tpu.memory_space<vmem>>, vector<1x2x8x128xf32>
    %34 = vector.shape_cast %33 : vector<1x2x8x128xf32> to vector<2x8x128xf32>
    %35 = vector.shape_cast %32 : vector<2x8x128xf32> to vector<1x2x8x128xf32>
    tpu.vector_store %arg6[%c0_19, %c0_20, %c0_21, %c0_22], %35 {strides = array<i32>} : memref<2x2x8x128xf32, #tpu.memory_space<vmem>>, vector<1x2x8x128xf32>,
    %36 = arith.mulf %27, %29 : vector<2x8x128xf32>
    %37 = arith.mulf %36, %30 : vector<2x8x128xf32>
    %c1_23 = arith.constant 1 : index
    %c0_24 = arith.constant 0 : index
    %c0_25 = arith.constant 0 : index
    %c0_26 = arith.constant 0 : index
    %38 = vector.load %arg6[%c1_23, %c0_24, %c0_25, %c0_26] : memref<2x2x8x128xf32, #tpu.memory_space<vmem>>, vector<1x2x8x128xf32>
    %39 = vector.shape_cast %38 : vector<1x2x8x128xf32> to vector<2x8x128xf32>
    %40 = vector.shape_cast %37 : vector<2x8x128xf32> to vector<1x2x8x128xf32>
    tpu.vector_store %arg6[%c1_23, %c0_24, %c0_25, %c0_26], %40 {strides = array<i32>} : memref<2x2x8x128xf32, #tpu.memory_space<vmem>>, vector<1x2x8x128xf32>,
    return
  }
}

</mosaic_0001>

<bundles_post_ra>
// kernel: _forward_device.1
= control target key start
LH: loop header
LB: loop body
LE: loop exit
PB: predicated region body
PF: predicated region fallthrough
CT: control target
= control target key end

     0   :  { %v720_v1 = vmov 0   ;;  %v721_v2 = vmov 0.0   ;;  %vm722_vm0 = vmmov 0   ;;  %s942_s2 = inlined_call_operand.vmem [shape: bf16[128,256], index: 2, kind: input, shape index: {}]   ;;  %s943_s0 = inlined_call_operand.vmem [shape: bf16[16,128], index: 0, kind: input, shape index: {}]   ;;  %s944_s1 = inlined_call_operand.vmem [shape: bf16[2,128,128], index: 1, kind: input, shape index: {}]   ;;  %s945_s3 = inlined_call_operand.<no memory space> [shape: f32[1], index: 3, kind: input, shape index: {}]   ;;  %s946_s5 = inlined_call_operand.vmem [shape: f32[2,2,8,128], index: 5, kind: output, shape index: {0}]   ;;  %s947_s4 = inlined_call_operand.vmem [shape: f32[2,8,128], index: 4, kind: input, shape index: {}]   ;;  %s948_s6 = inlined_call_operand.vmem [shape: f32[2,2,8,128], index: 6, kind: output, shape index: {1}]  }
   0x1   :  { %v667_v0 = vld [vmem:[%s942_s2 + $0x4] ss:$8 sps:$4 sm:$0xff]   ;;  %161 = vmatprep.mubr.bf16.mxu0 %v720_v1  ;;  %584 = vmatprep.subr.bf16.mxu1 %v721_v2  ;;  %v669_v3 = vld [vmem:[%s942_s2] ss:$8 sps:$4 sm:$0xff]   ;;  %v670_v4 = vld [vmem:[%s942_s2 + $0x14] ss:$8 sps:$4 sm:$0xff]   ;;  %v208_v43 = vstv %s945_s3 }
   0x2   :  { %129 = vmatprep.subr.bf16.mxu0 %v667_v0  ;;  %v672_v5 = vld [vmem:[%s942_s2 + $0x10] ss:$8 sps:$4 sm:$0xff]   ;;  %v673_v6 = vld [vmem:[%s942_s2 + $0x24] ss:$8 sps:$4 sm:$0xff]   ;;  %v675_v7 = vld [vmem:[%s942_s2 + $0x20] ss:$8 sps:$4 sm:$0xff]   ;;  %600 = vmatprep.mubr.msk.bf16.mxu1 %vm722_vm0, %v721_v2 }
   0x3   :  { %130 = vmatpush1.bf16.msra.mxu0 %v669_v3  ;;  %v676_v8 = vld [vmem:[%s942_s2 + $0x34] ss:$8 sps:$4 sm:$0xff]   ;;  %v678_v9 = vld [vmem:[%s942_s2 + $0x30] ss:$8 sps:$4 sm:$0xff]   ;;  %v679_v10 = vld [vmem:[%s942_s2 + $0x44] ss:$8 sps:$4 sm:$0xff]  }
   0x4   :  { %131 = vmatprep.subr.bf16.mxu0 %v670_v4  ;;  %v789_v11 = vld [vmem:[%s944_s1] sm:$0xff]   ;;  %v682_v13 = vld [vmem:[%s942_s2 + $0x54] ss:$8 sps:$4 sm:$0xff]   ;;  %v802_v14 = vld [vmem:[%s944_s1 + $0x8] sm:$0xff]  }
   0x5   :  { %585 = vmatpush3.bf16.xpose.msra.mxu1 %v789_v11  ;;  %v681_v12 = vld [vmem:[%s942_s2 + $0x40] ss:$8 sps:$4 sm:$0xff]   ;;  %v684_v15 = vld [vmem:[%s942_s2 + $0x50] ss:$8 sps:$4 sm:$0xff]   ;;  %v685_v16 = vld [vmem:[%s942_s2 + $0x64] ss:$8 sps:$4 sm:$0xff]  }
   0x6   :  { %586 = vmatprep.subr.bf16.mxu1 %v721_v2  ;;  %v687_v17 = vld [vmem:[%s942_s2 + $0x60] ss:$8 sps:$4 sm:$0xff]   ;;  %v688_v18 = vld [vmem:[%s942_s2 + $0x74] ss:$8 sps:$4 sm:$0xff]   ;;  %v690_v20 = vld [vmem:[%s942_s2 + $0x70] ss:$8 sps:$4 sm:$0xff]  }
   0x7   :  { %132 = vmatpush1.bf16.msra.mxu0 %v672_v5  ;;  %v821_v19 = vld [vmem:[%s944_s1 + $0x10] sm:$0xff]   ;;  %v691_v21 = vld [vmem:[%s943_s0] sm:$0xff]   ;;  %v835_v22 = vld [vmem:[%s944_s1 + $0x18] sm:$0xff]  }
   0x8   :  { %133 = vmatprep.subr.bf16.mxu0 %v673_v6  ;;  %v693_v23 = vld [vmem:[%s944_s1 + $0x40] sm:$0xff]   ;;  %v695_v25 = vld [vmem:[%s944_s1 + $0x48] sm:$0xff]   ;;  %v697_v27 = vld [vmem:[%s944_s1 + $0x50] sm:$0xff]  }
   0x9   :  { %v700_v24 = vld [vmem:[%s944_s1 + $0x20] sm:$0xff]   ;;  %v702_v26 = vld [vmem:[%s944_s1 + $0x28] sm:$0xff]   ;;  %v704_v28 = vld [vmem:[%s944_s1 + $0x30] sm:$0xff]  }
   0xa   :  { %v699_v29 = vld [vmem:[%s944_s1 + $0x58] sm:$0xff]   ;;  %v701_v31 = vld [vmem:[%s944_s1 + $0x60] sm:$0xff]   ;;  %v703_v32 = vld [vmem:[%s944_s1 + $0x68] sm:$0xff]  }
   0xb   :  { %134 = vmatpush1.bf16.msra.mxu0 %v675_v7  ;;  %v706_v30 = vld [vmem:[%s944_s1 + $0x38] sm:$0xff]   ;;  %v705_v33 = vld [vmem:[%s944_s1 + $0x70] sm:$0xff]  }
   0xc   :  { %135 = vmatprep.subr.bf16.mxu0 %v676_v8  ;;  %v707_v34 = vld [vmem:[%s944_s1 + $0x78] sm:$0xff]  }
   0xd   :  { %587 = vmatpush3.bf16.xpose.msra.mxu1 %v802_v14 }
   0xe   :  { %588 = vmatprep.subr.bf16.mxu1 %v721_v2 }
   0xf   :  { %136 = vmatpush1.bf16.msra.mxu0 %v678_v9 }
  0x10   :  { %137 = vmatprep.subr.bf16.mxu0 %v679_v10 }
  0x13   :  { %138 = vmatpush1.bf16.msra.mxu0 %v681_v12 }
  0x14   :  { %139 = vmatprep.subr.bf16.mxu0 %v682_v13 }
  0x15   :  { %589 = vmatpush3.bf16.xpose.msra.mxu1 %v821_v19 }
  0x16   :  { %590 = vmatprep.subr.bf16.mxu1 %v721_v2 }
  0x17   :  { %140 = vmatpush1.bf16.msra.mxu0 %v684_v15 }
  0x18   :  { %141 = vmatprep.subr.bf16.mxu0 %v685_v16 }
  0x1b   :  { %142 = vmatpush1.bf16.msra.mxu0 %v687_v17  ;;  %v488_v17 = vld [vmem:[%s947_s4] sm:$0xff] }
  0x1c   :  { %143 = vmatprep.subr.bf16.mxu0 %v688_v18 }
  0x1d   :  { %591 = vmatpush3.bf16.xpose.msra.mxu1 %v835_v22 }
  0x1e   :  { %592 = vmatprep.subr.bf16.mxu1 %v721_v2 }
  0x1f   :  { %144 = vmatpush1.bf16.msra.mxu0 %v690_v20 }
  0x20   :  { %604 = vmatprep.subr.bf16.mxu0 %v721_v2 }
  0x22   :  { %162 = vmatmul.mubr.bf16.vlgmr.msra.gmra.mrb[0].mxu0 %v691_v21  ;;  %v489_v21 = vld [vmem:[%s947_s4 + $0x8] sm:$0xff] }
  0x23   :  { %620 = vmatprep.mubr.msk.bf16.mxu0 %vm722_vm0, %v721_v2 }
  0x25   :  { %593 = vmatpush3.bf16.xpose.msra.mxu1 %v700_v24 }
  0x26   :  { %594 = vmatprep.subr.bf16.mxu1 %v721_v2 }
  0x28   :  { %605 = vmatpush3.bf16.xpose.msra.mxu0 %v693_v23 }
  0x29   :  { %606 = vmatprep.subr.bf16.mxu0 %v721_v2 }
  0x2d   :  { %595 = vmatpush3.bf16.xpose.msra.mxu1 %v702_v26 }
  0x2e   :  { %596 = vmatprep.subr.bf16.mxu1 %v721_v2 }
  0x30   :  { %607 = vmatpush3.bf16.xpose.msra.mxu0 %v695_v25 }
  0x31   :  { %608 = vmatprep.subr.bf16.mxu0 %v721_v2 }
  0x35   :  { %597 = vmatpush3.bf16.xpose.msra.mxu1 %v704_v28 }
  0x36   :  { %598 = vmatprep.subr.bf16.mxu1 %v721_v2 }
  0x38   :  { %609 = vmatpush3.bf16.xpose.msra.mxu0 %v697_v27 }
  0x39   :  { %610 = vmatprep.subr.bf16.mxu0 %v721_v2 }
  0x3d   :  { %599 = vmatpush3.bf16.xpose.msra.mxu1 %v706_v30 }
  0x3e   :  { %624 = vmatprep.subr.bf16.mxu1 %v721_v2 }
  0x40   :  { %611 = vmatpush3.bf16.xpose.msra.mxu0 %v699_v29 }
  0x41   :  { %612 = vmatprep.subr.bf16.mxu0 %v721_v2 }
  0x48   :  { %613 = vmatpush3.bf16.xpose.msra.mxu0 %v701_v31 }
  0x49   :  { %614 = vmatprep.subr.bf16.mxu0 %v721_v2 }
  0x50   :  { %615 = vmatpush3.bf16.xpose.msra.mxu0 %v703_v32 }
  0x51   :  { %616 = vmatprep.subr.bf16.mxu0 %v721_v2 }
  0x58   :  { %617 = vmatpush3.bf16.xpose.msra.mxu0 %v705_v33 }
  0x59   :  { %618 = vmatprep.subr.bf16.mxu0 %v721_v2 }
  0x60   :  { %619 = vmatpush3.bf16.xpose.msra.mxu0 %v707_v34 }
  0x61   :  { %644 = vmatprep.subr.bf16.mxu0 %v721_v2 }
  0xf5   :  { %v163_v35 = vpop.f32.mrb[0].mxu0 }
  0xf6   :  { %v172_v36 = vpack.c.bf16 %v163_v35, %v163_v35  ;;  %v165_v37 = vpop.f32.mrb[1].mxu0 }
  0xf7   :  { %v167_v38 = vpop.f32.mrb[2].mxu0  ;;  %v174_v41 = vpack.c.bf16 %v165_v37, %v165_v37 }
  0xf8   :  { %v173_v39 = vpack.c.bf16 %v167_v38, %v167_v38  ;;  %v169_v40 = vpop.f32.mrb[3].mxu0  ;;  %601 = vmatmul.mubr.bf16.vlgmr.msra.gmra.mrb[0].mxu1 %v172_v36 }
  0xf9   :  { %625 = vmatpush3.bf16.xpose.msra.mxu1 %v789_v11  ;;  %640 = vmatprep.mubr.msk.bf16.mxu1 %vm722_vm0, %v721_v2  ;;  %v175_v42 = vpack.c.bf16 %v169_v40, %v169_v40 }
  0xfa   :  { %621 = vmatmul.mubr.bf16.vlgmr.msra.gmra.mrb[4].mxu0 %v173_v39  ;;  %626 = vmatprep.subr.bf16.mxu1 %v721_v2 }
  0xfb   :  { %645 = vmatpush3.bf16.xpose.msra.mxu0 %v693_v23  ;;  %660 = vmatprep.mubr.msk.bf16.mxu0 %vm722_vm0, %v721_v2 }
  0xfc   :  { %646 = vmatprep.subr.bf16.mxu0 %v721_v2 }
 0x101   :  { %627 = vmatpush3.bf16.xpose.msra.mxu1 %v802_v14 }
 0x102   :  { %628 = vmatprep.subr.bf16.mxu1 %v721_v2 }
 0x103   :  { %647 = vmatpush3.bf16.xpose.msra.mxu0 %v695_v25 }
 0x104   :  { %648 = vmatprep.subr.bf16.mxu0 %v721_v2 }
 0x109   :  { %629 = vmatpush3.bf16.xpose.msra.mxu1 %v821_v19 }
 0x10a   :  { %630 = vmatprep.subr.bf16.mxu1 %v721_v2 }
 0x10b   :  { %649 = vmatpush3.bf16.xpose.msra.mxu0 %v697_v27 }
 0x10c   :  { %650 = vmatprep.subr.bf16.mxu0 %v721_v2 }
 0x111   :  { %631 = vmatpush3.bf16.xpose.msra.mxu1 %v835_v22 }
 0x112   :  { %632 = vmatprep.subr.bf16.mxu1 %v721_v2 }
 0x113   :  { %651 = vmatpush3.bf16.xpose.msra.mxu0 %v699_v29 }
 0x114   :  { %652 = vmatprep.subr.bf16.mxu0 %v721_v2 }
 0x119   :  { %633 = vmatpush3.bf16.xpose.msra.mxu1 %v700_v24 }
 0x11a   :  { %634 = vmatprep.subr.bf16.mxu1 %v721_v2 }
 0x11b   :  { %653 = vmatpush3.bf16.xpose.msra.mxu0 %v701_v31 }
 0x11c   :  { %654 = vmatprep.subr.bf16.mxu0 %v721_v2 }
 0x121   :  { %635 = vmatpush3.bf16.xpose.msra.mxu1 %v702_v26 }
 0x122   :  { %636 = vmatprep.subr.bf16.mxu1 %v721_v2 }
 0x123   :  { %655 = vmatpush3.bf16.xpose.msra.mxu0 %v703_v32 }
 0x124   :  { %656 = vmatprep.subr.bf16.mxu0 %v721_v2 }
 0x129   :  { %637 = vmatpush3.bf16.xpose.msra.mxu1 %v704_v28 }
 0x12a   :  { %638 = vmatprep.subr.bf16.mxu1 %v721_v2 }
 0x12b   :  { %657 = vmatpush3.bf16.xpose.msra.mxu0 %v705_v33 }
 0x12c   :  { %658 = vmatprep.subr.bf16.mxu0 %v721_v2 }
 0x131   :  { %639 = vmatpush3.bf16.xpose.msra.mxu1 %v706_v30 }
 0x133   :  { %659 = vmatpush3.bf16.xpose.msra.mxu0 %v707_v34 }
 0x138   :  { %641 = vmatmul.mubr.bf16.vlgmr.msra.gmra.mrb[4].mxu1 %v174_v41 }
 0x13a   :  { %661 = vmatmul.mubr.bf16.vlgmr.msra.gmra.mrb[8].mxu0 %v175_v42 }
 0x1cb   :  { %v291_v44 = vpop.f32.mrb[0].mxu1 }
 0x1cc   :  { %v292_v45 = vadd.f32 %v291_v44, %v208_v43  ;;  %v602_v46 = vpop.f32.mrb[1].mxu1 }
 0x1cd   :  { %v294_v47 = vpop.f32.mrb[2].mxu1  ;;  %v379_v48 = vpop.f32.mrb[4].mxu0 }
 0x1ce   :  { %465 = vst [vmem:[%s946_s5] sm:$0xff] %v292_v45  ;;  %v380_v49 = vadd.f32 %v379_v48, %v208_v43  ;;  %v603_v50 = vpop.f32.mrb[3].mxu1  ;;  %v622_v51 = vpop.f32.mrb[5].mxu0 }
 0x1cf   :  { %v382_v52 = vpop.f32.mrb[6].mxu0 }
 0x1d0   :  { %466 = vst [vmem:[%s946_s5 + $0x8] sm:$0xff] %v380_v49  ;;  %v623_v53 = vpop.f32.mrb[7].mxu0 }
 0x20b   :  { %v419_v54 = vpop.f32.mrb[4].mxu1 }
 0x20c   :  { %v420_v55 = vadd.f32 %v419_v54, %v208_v43  ;;  %v642_v56 = vpop.f32.mrb[5].mxu1 }
 0x20d   :  { %v422_v57 = vpop.f32.mrb[6].mxu1  ;;  %v459_v58 = vpop.f32.mrb[8].mxu0 }
 0x20e   :  { %544 = vst [vmem:[%s946_s5 + $0x10] sm:$0xff] %v420_v55  ;;  %v470_v59 = vmax.f32 %v292_v45, %v420_v55  ;;  %v460_v60 = vadd.f32 %v459_v58, %v208_v43  ;;  %v643_v61 = vpop.f32.mrb[7].mxu1  ;;  %v662_v62 = vpop.f32.mrb[9].mxu0 }
 0x20f   :  { %v462_v63 = vpop.f32.mrb[10].mxu0 }
 0x210   :  { %v472_v0 = vsub.f32 %v292_v45, %v470_v59  ;;  %v478_v1 = vsub.f32 %v420_v55, %v470_v59  ;;  %545 = vst [vmem:[%s946_s5 + $0x18] sm:$0xff] %v460_v60  ;;  %v471_v2 = vmax.f32 %v380_v49, %v460_v60  ;;  %v663_v3 = vpop.f32.mrb[11].mxu0 }
 0x212   :  { %v474_v4 = vmul.f32 1.442695, %v472_v0  ;;  %v480_v5 = vmul.f32 1.442695, %v478_v1  ;;  %v473_v6 = vsub.f32 %v380_v49, %v471_v2  ;;  %v479_v7 = vsub.f32 %v460_v60, %v471_v2 }
 0x214   :  { %708 = vpow2.f32 %v474_v4  ;;  %v476_v8 = vmul.f32 1.442695, %v473_v6  ;;  %v482_v9 = vmul.f32 1.442695, %v479_v7 }
 0x215   :  { %710 = vpow2.f32 %v480_v5 }
 0x216   :  { %712 = vpow2.f32 %v476_v8 }
 0x217   :  { %714 = vpow2.f32 %v482_v9 }
 0x21e   :  { %v709_v10 = vpop.eup %708 }
 0x21f   :  { %v711_v11 = vpop.eup %710 }
 0x220   :  { %v713_v12 = vpop.eup %712  ;;  %v484_v13 = vadd.f32 %v711_v11, %v709_v10 }
 0x221   :  { %v715_v14 = vpop.eup %714 }
 0x222   :  { %716 = vrcp.f32 %v484_v13  ;;  %v485_v15 = vadd.f32 %v715_v14, %v713_v12 }
 0x224   :  { %718 = vrcp.f32 %v485_v15 }
 0x22c   :  { %v717_v16 = vpop.eup %716 }
 0x22d   :  { %v490_v18 = vmul.f32 %v717_v16, %v709_v10  ;;  %v496_v19 = vmul.f32 %v717_v16, %v711_v11 }
 0x22e   :  { %v719_v20 = vpop.eup %718 }
 0x22f   :  { %v492_v22 = vmul.f32 %v490_v18, %v488_v17  ;;  %v498_v23 = vmul.f32 %v496_v19, %v488_v17  ;;  %v491_v24 = vmul.f32 %v719_v20, %v713_v12  ;;  %v497_v25 = vmul.f32 %v719_v20, %v715_v14 }
 0x231   :  { %494 = vst [vmem:[%s948_s6] sm:$0xff] %v492_v22  ;;  %546 = vst [vmem:[%s948_s6 + $0x10] sm:$0xff] %v498_v23  ;;  %v493_v26 = vmul.f32 %v491_v24, %v489_v21  ;;  %v499_v27 = vmul.f32 %v497_v25, %v489_v21 }
 0x233   :  { %495 = vst [vmem:[%s948_s6 + $0x8] sm:$0xff] %v493_v26  ;;  %547 = vst [vmem:[%s948_s6 + $0x18] sm:$0xff] %v499_v27 }

</bundles_post_ra>
